<compile_context>
chip_gen: v7x
topology: tpu7x:2x2x1
jax: 0.10.0
libtpu: 0.0.40
codegen_flags: <defaults>
</compile_context>

<pallas_src>
import functools

import jax
import jax.numpy as jnp
from jax.experimental import pallas as pl
from jax.experimental.pallas import tpu as pltpu

MARGIN = 1.0
EPS = 1e-6  # matches torch.nn.functional.pairwise_distance default eps


def _round_up(x, m):
    return ((x + m - 1) // m) * m


def _triplet_kernel(a_ref, p_ref, n_ref, out_ref, *, margin, eps, n_rows, tile_n):
    i = pl.program_id(0)

    a = a_ref[...].astype(jnp.float32)
    p = p_ref[...].astype(jnp.float32)
    n = n_ref[...].astype(jnp.float32)

    # Hoist the diffs; square once (don't rely on CSE of duplicated exprs).
    ap = a - p + eps
    an = a - n + eps

    # Keep reductions 2D -> (tile_n, 1) stays on the sublane layout.
    d_ap = jnp.sqrt(jnp.sum(ap * ap, axis=-1, keepdims=True))   # (tile_n, 1)
    d_an = jnp.sqrt(jnp.sum(an * an, axis=-1, keepdims=True))   # (tile_n, 1)

    per_row = jnp.maximum(d_ap - d_an + margin, 0.0)            # (tile_n, 1)

    # Mask padded tail rows so they don't contribute to the sum.
    row = jax.lax.broadcasted_iota(jnp.int32, (tile_n, 1), 0) + i * tile_n
    per_row = jnp.where(row < n_rows, per_row, 0.0)

    partial = jnp.sum(per_row)                                  # scalar partial
    # Lane-dense (1, 1, 128) write: unmasked store, one tile per block.
    out_ref[...] = jnp.broadcast_to(partial, (1, 1, 128)).astype(jnp.float32)


def triplet_loss(anchor, positive, negative, *, tile_n=None, margin=MARGIN, eps=EPS):
    """anchor/positive/negative: (N, D) arrays (f32 or bf16). Returns scalar f32."""
    assert anchor.shape == positive.shape == negative.shape
    assert anchor.ndim == 2
    N, D = anchor.shape
    itemsize = jnp.dtype(anchor.dtype).itemsize

    # Sublane packing: f32 -> 8 rows/vreg, bf16 -> 16, int8/fp8 -> 32.
    sublane = {4: 8, 2: 16, 1: 32}.get(itemsize, 8)

    # ~1 MiB per f32 input block at D=128; clamp for small N.
    if tile_n is None:
        tile_n = 2048
    tile_n = max(sublane, min(tile_n, _round_up(N, sublane)))
    tile_n = _round_up(tile_n, sublane)

    num_blocks = pl.cdiv(N, tile_n)

    # 3 inputs x 2 pipeline buffers per block, plus tiny output tiles + headroom.
    block_bytes = tile_n * D * itemsize
    vmem_needed = 3 * 2 * block_bytes + 2 * (1 * 128 * 4) + (1 << 20)
    vmem_limit = int(min(max(vmem_needed, 16 << 20), 48 << 20))

    cost = pl.CostEstimate(
        flops=10 * N * D,
        transcendentals=2 * N,
        bytes_accessed=3 * N * D * itemsize + num_blocks * 128 * 4,
    )

    kernel = functools.partial(
        _triplet_kernel, margin=margin, eps=eps, n_rows=N, tile_n=tile_n
    )

    partials = pl.pallas_call(
        kernel,
        grid=(num_blocks,),
        in_specs=[
            pl.BlockSpec((tile_n, D), lambda i: (i, 0)),
            pl.BlockSpec((tile_n, D), lambda i: (i, 0)),
            pl.BlockSpec((tile_n, D), lambda i: (i, 0)),
        ],
        out_specs=pl.BlockSpec((1, 1, 128), lambda i: (i, 0, 0)),
        out_shape=jax.ShapeDtypeStruct((num_blocks, 1, 128), jnp.float32),
        compiler_params=pltpu.CompilerParams(
            dimension_semantics=("parallel",),
            vmem_limit_bytes=vmem_limit,
        ),
        cost_estimate=cost,
    )(anchor, positive, negative)

    # Final reduction (num_blocks partials) + true-N mean in plain JAX.
    return jnp.sum(partials[:, 0, 0]) / N


def _triplet_loss_ref(anchor, positive, negative, margin=MARGIN, eps=EPS):
    # Pure-JAX reference mirroring torch.nn.TripletMarginLoss(margin=1.0, p=2).
    a = anchor.astype(jnp.float32)
    p = positive.astype(jnp.float32)
    n = negative.astype(jnp.float32)
    d_ap = jnp.sqrt(jnp.sum((a - p + eps) ** 2, axis=-1))
    d_an = jnp.sqrt(jnp.sum((a - n + eps) ** 2, axis=-1))
    return jnp.mean(jnp.maximum(d_ap - d_an + margin, 0.0))


if __name__ == "__main__":
    key = jax.random.PRNGKey(0)
    ka, kp, kn = jax.random.split(key, 3)
    # N=20 with tile_n=8 -> 3 grid blocks, last block padded (exercises masking).
    N, D = 20, 128
    anchor = jax.random.normal(ka, (N, D), dtype=jnp.float32)
    positive = jax.random.normal(kp, (N, D), dtype=jnp.float32)
    negative = jax.random.normal(kn, (N, D), dtype=jnp.float32)

    out = triplet_loss(anchor, positive, negative, tile_n=8)
    jax.block_until_ready(out)

    ref = _triplet_loss_ref(anchor, positive, negative)
    assert jnp.allclose(out, ref, rtol=1e-5, atol=1e-5), (out, ref)

    # TODO(synk): soft_dice() is defined on the module but unused in forward(); not implemented.
    print("KERNEL_OK")
</pallas_src>

<mosaic_0001>
module attributes {stable_mosaic.version = 11 : i64} {
  func.func @_triplet_kernel(%arg0: i32, %arg1: memref<8x128xf32, #tpu.memory_space<vmem>>, %arg2: memref<8x128xf32, #tpu.memory_space<vmem>>, %arg3: memref<8x128xf32, #tpu.memory_space<vmem>>, %arg4: memref<1x1x128xf32, #tpu.memory_space<vmem>>) attributes {dimension_semantics = [#tpu.dimension_semantics<parallel>], iteration_bounds = array<i64: 3>, scalar_prefetch = 0 : i64, scratch_operands = 0 : i64, tpu.core_type = #tpu.core_type<tc>, window_params = [{transform_indices = @transform_0, window_bounds = array<i64: 8, 128>}, {transform_indices = @transform_1, window_bounds = array<i64: 8, 128>}, {transform_indices = @transform_2, window_bounds = array<i64: 8, 128>}, {transform_indices = @transform_3, window_bounds = array<i64: 1, 1, 128>}]} {
    %c0 = arith.constant 0 : index
    %c0_0 = arith.constant 0 : index
    %0 = vector.load %arg1[%c0, %c0_0] : memref<8x128xf32, #tpu.memory_space<vmem>>, vector<8x128xf32>
    %c0_1 = arith.constant 0 : index
    %c0_2 = arith.constant 0 : index
    %1 = vector.load %arg2[%c0_1, %c0_2] : memref<8x128xf32, #tpu.memory_space<vmem>>, vector<8x128xf32>
    %c0_3 = arith.constant 0 : index
    %c0_4 = arith.constant 0 : index
    %2 = vector.load %arg3[%c0_3, %c0_4] : memref<8x128xf32, #tpu.memory_space<vmem>>, vector<8x128xf32>
    %3 = arith.subf %0, %1 : vector<8x128xf32>
    %cst = arith.constant 9.99999997E-7 : f32
    %4 = vector.broadcast %cst : f32 to vector<8x128xf32>
    %5 = arith.addf %3, %4 : vector<8x128xf32>
    %6 = arith.subf %0, %2 : vector<8x128xf32>
    %cst_5 = arith.constant 9.99999997E-7 : f32
    %7 = vector.broadcast %cst_5 : f32 to vector<8x128xf32>
    %8 = arith.addf %6, %7 : vector<8x128xf32>
    %9 = arith.mulf %5, %5 : vector<8x128xf32>
    %cst_6 = arith.constant dense<0.000000e+00> : vector<8xf32>
    %10 = vector.multi_reduction <add>, %9, %cst_6 [1] : vector<8x128xf32> to vector<8xf32>
    %11 = vector.shape_cast %10 : vector<8xf32> to vector<8x1xf32>
    %12 = math.sqrt %11 : vector<8x1xf32>
    %13 = arith.mulf %8, %8 : vector<8x128xf32>
    %cst_7 = arith.constant dense<0.000000e+00> : vector<8xf32>
    %14 = vector.multi_reduction <add>, %13, %cst_7 [1] : vector<8x128xf32> to vector<8xf32>
    %15 = vector.shape_cast %14 : vector<8xf32> to vector<8x1xf32>
    %16 = math.sqrt %15 : vector<8x1xf32>
    %17 = arith.subf %12, %16 : vector<8x1xf32>
    %cst_8 = arith.constant 1.000000e+00 : f32
    %18 = vector.broadcast %cst_8 : f32 to vector<8x1xf32>
    %19 = arith.addf %17, %18 : vector<8x1xf32>
    %cst_9 = arith.constant 0.000000e+00 : f32
    %20 = vector.broadcast %cst_9 : f32 to vector<8x1xf32>
    %21 = arith.maximumf %19, %20 : vector<8x1xf32>
    %22 = tpu.iota {dimensions = array<i32: 0>} : vector<8x1xi32>
    %c8_i32 = arith.constant 8 : i32
    %23 = arith.muli %arg0, %c8_i32 : i32
    %24 = vector.broadcast %23 : i32 to vector<8x1xi32>
    %25 = arith.addi %22, %24 : vector<8x1xi32>
    %c20_i32 = arith.constant 20 : i32
    %26 = vector.broadcast %c20_i32 : i32 to vector<8x1xi32>
    %27 = arith.cmpi slt, %25, %26 : vector<8x1xi32>
    %cst_10 = arith.constant 0.000000e+00 : f32
    %28 = vector.broadcast %cst_10 : f32 to vector<8x1xf32>
    %29 = arith.select %27, %21, %28 : vector<8x1xi1>, vector<8x1xf32>
    %30 = vector.shape_cast %29 : vector<8x1xf32> to vector<1x8x1xf32>
    %cst_11 = arith.constant dense<0.000000e+00> : vector<1xf32>
    %31 = vector.multi_reduction <add>, %30, %cst_11 [1, 2] : vector<1x8x1xf32> to vector<1xf32>
    %32 = vector.shape_cast %31 : vector<1xf32> to vector<1x1x1xf32>
    %33 = vector.extract %32[0, 0, 0] : f32 from vector<1x1x1xf32>
    %34 = vector.broadcast %33 : f32 to vector<1x1x128xf32>
    %c0_12 = arith.constant 0 : index
    %c0_13 = arith.constant 0 : index
    %c0_14 = arith.constant 0 : index
    %35 = vector.load %arg4[%c0_12, %c0_13, %c0_14] : memref<1x1x128xf32, #tpu.memory_space<vmem>>, vector<1x1x128xf32>
    tpu.vector_store %arg4[%c0_12, %c0_13, %c0_14], %34 {strides = array<i32>} : memref<1x1x128xf32, #tpu.memory_space<vmem>>, vector<1x1x128xf32>,
    return
  }
  func.func @transform_0(%arg0: i32) -> (i32, i32) {
    %c0_i32 = arith.constant 0 : i32
    %c0_i32_0 = arith.constant 0 : i32
    return %arg0, %c0_i32 : i32, i32
  }
  func.func @transform_1(%arg0: i32) -> (i32, i32) {
    %c0_i32 = arith.constant 0 : i32
    %c0_i32_0 = arith.constant 0 : i32
    return %arg0, %c0_i32 : i32, i32
  }
  func.func @transform_2(%arg0: i32) -> (i32, i32) {
    %c0_i32 = arith.constant 0 : i32
    %c0_i32_0 = arith.constant 0 : i32
    return %arg0, %c0_i32 : i32, i32
  }
  func.func @transform_3(%arg0: i32) -> (i32, i32, i32) {
    %c0_i32 = arith.constant 0 : i32
    %c0_i32_0 = arith.constant 0 : i32
    %c0_i32_1 = arith.constant 0 : i32
    return %arg0, %c0_i32, %c0_i32_0 : i32, i32, i32
  }
}

</mosaic_0001>

<bundles_post_ra>
// kernel: tpu_custom_call.1
= control target key start
LH: loop header
LB: loop body
LE: loop exit
PB: predicated region body
PF: predicated region fallthrough
CT: control target
= control target key end

     0   :  { %s922_s0 = inlined_call_operand.hbm [shape: f32[20,128], index: 0, kind: input, shape index: {}]   ;;  %s923_s1 = inlined_call_operand.hbm [shape: f32[20,128], index: 1, kind: input, shape index: {}]   ;;  %s924_s2 = inlined_call_operand.hbm [shape: f32[20,128], index: 2, kind: input, shape index: {}]   ;;  %s925_s3 = inlined_call_operand.hbm [shape: f32[3,1,128], index: 3, kind: output, shape index: {}]  }
   0x1   :  { %930 = sst [smem:[#allocation12_spill]] %s923_s1 }
   0x2   :  { %8 = vsyncpa [#allocation3], 0 }
   0x3   :  { %10 = vsyncpa [#allocation3 + $0x1], 0 }
   0x4   :  { %11 = vsyncpa [#allocation6], 0 }
   0x5   :  { %13 = vsyncpa [#allocation6 + $0x1], 0 }
   0x6   :  { %14 = vsyncpa [#allocation4], 0 }
   0x7   :  { %16 = vsyncpa [#allocation4 + $0x1], 0  ;;  %s693_s12 = smov 0   ;;  %s695_s13 = smov 0  }
   0x8   :  { %s697_s14 = smov 0   ;;  %s699_s15 = smov 0  }
   0x9 LB: > { %s714_s16 = sadd.s32 4294967295, %s667_s15   ;;  %s428_s17 = sadd.s32 4294967294, %s667_s15   ;;  %s667_s15 = sphi %s699_s15, %s948_s15   ;;  %s663_s14 = sphi %s697_s14, %s947_s14   ;;  %s659_s13 = sphi %s695_s13, %s946_s13   ;;  %s655_s12 = sphi %s693_s12, %s945_s12  }
   0xa   : > { %s718_s18 = sadd.s32 1, %s667_s15   ;;  %s29_s19 = sadd.s32 1, %s663_s14 }
   0xb   : > { %s26_s20 = ssub.s32 %s667_s15, %s718_s18  ;;  %p36_p0 = scmp.ne.s32.totalorder %s663_s14, %s659_s13 }
   0xc   : > { %p27_p1 = scmp.eq.s32.totalorder %s26_s20, 0  ;;  %p37_p2 = scmp.eq.s32.totalorder %s667_s15, 0 }
   0xd   : > { %p42_p3 = scmp.ne.s32.totalorder %s659_s13, %s655_s12  ;;  %p43_p4 = scmp.eq.s32.totalorder %s714_s16, 0 }
   0xe   : > { %s730_s21 = scalar_select %p27_p1, %s663_s14, %s29_s19  }
   0xf   : > { %p38_p5 = por %p37_p2, %p36_p0  ;;  %p732_p6 = por %p43_p4, %p42_p3 }
  0x10   : > { %p118_p7 = scmp.eq.s32.totalorder %s714_s16, 2  ;;  %p124_p8 = scmp.eq.s32.totalorder %s428_s17, 2 }
  0x11   : > { %s931_s22 = scalar_select %p732_p6, 1, 0 }
  0x12   : > { %p469_p9 = scmp.lt.s32.totalorder %s667_s15, 3  ;;  %p738_p10 = por %p118_p7, %p36_p0 }
  0x13   : > { %p742_p11 = por %p124_p8, %p42_p3  ;;  %s144_s25 = sand.u32 1, %s663_s14  }
  0x14   : > { %s932_s23 = scalar_select %p738_p10, 1, 0 }
  0x15   : > { %s933_s24 = scalar_select %p742_p11, 1, 0 }
  0x16   : > { %s748_s26 = sshll.u32 %s667_s15, 7  ;;  %s752_s27 = sshll.u32 %s144_s25, 3 }
  0x17   : > { %p754_p12 = pnand %p469_p9, %p38_p5  ;;  %s162_s29 = sand.u32 1, %s667_s15  }
  0x18   : > { %s935_s1 = sld [smem:[#allocation12_spill]]  ;;  %s166_s6 = scalar_lea.vmem [#allocation5], %s752_s27 }
  0x19   : > { %s934_s28 = scalar_select %p754_p12, 1, 0 }
  0x1a   : > { %s173_s7 = sshll.u32 %s166_s6, 4  ;;  %s769_s8 = scalar_lea.sflag [#allocation6], %s162_s29  ;;  %s766_s7 = int_to_ptr.vmem [resolvable:$true] %s173_s7 }
  0x1b   : > { %p775_p1 = pneg %p754_p12 }
  0x1e   : > { %s763_s5 = scalar_lea.hbm %s935_s1, %s748_s26  ;;  %s512_s19 = scalar_lea.hbm %s935_s1, 384 }
  0x1f   : > { %s507_s9 = scalar_lea.hbm %s763_s5, 128  ;;  %p513_p4 = scmp.lt.u32.totalorder %s763_s5, %s935_s1 }
  0x20   : > { %p508_p0 = scmp.ne.s32.totalorder %s763_s5, %s507_s9  ;;  %p514_p5 = scmp.lt.u32.totalorder %s512_s19, %s507_s9 }
  0x21   : > { %p516_p8 = scmp.lt.u32.totalorder %s507_s9, %s763_s5 }
  0x22   : > { %p510_p2 = pnand %p775_p1, %p508_p0  ;;  %p515_p7 = por %p514_p5, %p513_p4 }
  0x24   : > { %p511_p3 = pneg %p510_p2  ;;  %p517_p9 = por %p516_p8, %p515_p7 }
  0x26   : > { %p518_p13 = pnand %p517_p9, %p511_p3 }
  0x28   : > { %521 = shalt.err (!%p518_p13)
}
  0x29   : > { %s522_s29 = scalar_lea.vmem %s766_s7, 128  ;;  %s669_s4 = smov [#allocation5]  }
  0x2a   : > { %p523_p0 = scmp.ne.s32.totalorder %s766_s7, %s522_s29  ;;  %s527_s6 = sshll.u32 %s669_s4, 4  ;;  %s528_s6 = int_to_ptr.vmem [resolvable:$false] %s527_s6 }
  0x2b   : > { %s529_s11 = scalar_lea.vmem %s528_s6, 256  ;;  %p530_p10 = scmp.lt.s32.totalorder %s766_s7, %s528_s6 }
  0x2c   : > { %p525_p2 = pnand %p523_p0, %p775_p1  ;;  %p531_p6 = scmp.lt.s32.totalorder %s529_s11, %s522_s29 }
  0x2e   : > { %p526_p11 = pneg %p525_p2  ;;  %p532_p4 = por %p531_p6, %p530_p10 }
  0x30   : > { %p533_p5 = pnand %p532_p4, %p526_p11 }
  0x32   : > { %536 = shalt.err (!%p533_p5)
}
  0x33   : > { %461 = dma.hbm_to_vmem [thread:$0]  (!%p754_p12), %s763_s5, 128, %s766_s7, %s769_s8  }
  0x34   : > { %p196_p13 = scmp.lt.s32.totalorder %s667_s15, 4  ;;  %s804_s19 = scalar_lea.hbm %s922_s0, %s748_s26 }
  0x35   : > { %p937_p6 = scmp.ge.s32.totalorder %s667_s15, 1  ;;  %s148_s30 = scalar_lea.vmem [#allocation2], %s752_s27 }
  0x36   : > { %s155_s29 = sshll.u32 %s148_s30, 4  ;;  %s145_s5 = scalar_lea.sflag [#allocation3], %s144_s25  ;;  %s156_s29 = int_to_ptr.vmem [resolvable:$true] %s155_s29 }
  0x37   : > { %p808_p10 = pnand %p937_p6, %p196_p13  ;;  %s537_s7 = scalar_lea.hbm %s804_s19, 128 }
  0x38   : > { %p538_p11 = scmp.ne.s32.totalorder %s804_s19, %s537_s7  ;;  %s542_s11 = scalar_lea.hbm %s922_s0, 384 }
  0x39   : > { %s938_s20 = scalar_select %p808_p10, 1, 0 }
  0x3a   : > { %p540_p3 = pnand %p538_p11, %p775_p1  ;;  %p543_p8 = scmp.lt.u32.totalorder %s804_s19, %s922_s0 }
  0x3b   : > { %p544_p9 = scmp.lt.u32.totalorder %s542_s11, %s537_s7  ;;  %p546_p2 = scmp.lt.u32.totalorder %s537_s7, %s804_s19 }
  0x3c   : > { %p541_p7 = pneg %p540_p3 }
  0x3d   : > { %p545_p0 = por %p544_p9, %p543_p8 }
  0x3f   : > { %p547_p4 = por %p546_p2, %p545_p0 }
  0x41   : > { %p548_p5 = pnand %p547_p4, %p541_p7 }
  0x43   : > { %551 = shalt.err (!%p548_p5)
}
  0x44   : > { %s552_s25 = scalar_lea.vmem %s156_s29, 128  ;;  %s670_s30 = smov [#allocation2]  }
  0x45   : > { %p553_p13 = scmp.ne.s32.totalorder %s156_s29, %s552_s25  ;;  %s557_s1 = sshll.u32 %s670_s30, 4  ;;  %s558_s1 = int_to_ptr.vmem [resolvable:$false] %s557_s1 }
  0x46   : > { %s559_s4 = scalar_lea.vmem %s558_s1, 256  ;;  %p560_p3 = scmp.lt.s32.totalorder %s156_s29, %s558_s1 }
  0x47   : > { %p555_p6 = pnand %p553_p13, %p775_p1  ;;  %p561_p10 = scmp.lt.s32.totalorder %s559_s4, %s552_s25 }
  0x49   : > { %p556_p11 = pneg %p555_p6  ;;  %p562_p12 = por %p561_p10, %p560_p3 }
  0x4b   : > { %p563_p8 = pnand %p562_p12, %p556_p11 }
  0x4d   : > { %566 = shalt.err (!%p563_p8)
}
  0x4e   : > { %p939_p9 = scmp.ne.s32.totalorder %s934_s28, 0  ;;  %s836_s11 = scalar_lea.hbm %s924_s2, %s748_s26 }
  0x4f   : > { %s184_s1 = scalar_lea.vmem [#allocation7], %s752_s27  ;;  %s567_s17 = scalar_lea.hbm %s836_s11, 128 }
  0x50   : > { %458 = dma.hbm_to_vmem [thread:$0]  (!%p939_p9), %s804_s19, 128, %s156_s29, %s145_s5  }
  0x51   : > { %s191_s9 = sshll.u32 %s184_s1, 4  ;;  %p568_p12 = scmp.ne.s32.totalorder %s836_s11, %s567_s17  ;;  %s192_s9 = int_to_ptr.vmem [resolvable:$true] %s191_s9 }
  0x52   : > { %s572_s19 = scalar_lea.hbm %s924_s2, 384  ;;  %p573_p0 = scmp.lt.u32.totalorder %s836_s11, %s924_s2 }
  0x53   : > { %p570_p10 = pnand %p568_p12, %p775_p1  ;;  %p574_p2 = scmp.lt.u32.totalorder %s572_s19, %s567_s17 }
  0x54   : > { %p576_p5 = scmp.lt.u32.totalorder %s567_s17, %s836_s11 }
  0x55   : > { %p571_p7 = pneg %p570_p10  ;;  %p575_p4 = por %p574_p2, %p573_p0 }
  0x57   : > { %p577_p13 = por %p576_p5, %p575_p4 }
  0x59   : > { %p578_p6 = pnand %p577_p13, %p571_p7 }
  0x5b   : > { %581 = shalt.err (!%p578_p6)
}
  0x5c   : > { %s582_s26 = scalar_lea.vmem %s192_s9, 128  ;;  %s671_s27 = smov [#allocation7]  }
  0x5d   : > { %p583_p11 = scmp.ne.s32.totalorder %s192_s9, %s582_s26  ;;  %s587_s4 = sshll.u32 %s671_s27, 4  ;;  %s588_s4 = int_to_ptr.vmem [resolvable:$false] %s587_s4 }
  0x5e   : > { %s589_s7 = scalar_lea.vmem %s588_s4, 256  ;;  %p590_p12 = scmp.lt.s32.totalorder %s192_s9, %s588_s4 }
  0x5f   : > { %p585_p3 = pnand %p583_p11, %p775_p1  ;;  %p591_p10 = scmp.lt.s32.totalorder %s589_s7, %s582_s26 }
  0x61   : > { %p586_p8 = pneg %p585_p3  ;;  %p592_p9 = por %p591_p10, %p590_p12 }
  0x63   : > { %p593_p0 = pnand %p592_p9, %p586_p8 }
  0x65   : > { %596 = shalt.err (!%p593_p0)
}
  0x66   : > { %p940_p2 = scmp.ne.s32.totalorder %s934_s28, 0  ;;  %p941_p7 = scmp.ne.s32.totalorder %s938_s20, 0 }
  0x67   : > { %s860_s10 = sand.u32 (!%p941_p7), 1, %s659_s13   ;;  %p942_p1 = scmp.ne.s32.totalorder (!%p941_p7), %s931_s22, 0 }
  0x68   : > { %464 = dma.hbm_to_vmem [thread:$0]  (!%p940_p2), %s836_s11, 128, %s192_s9, %s769_s8  }
  0x69   : > { %200 = sbr.rel (%p941_p7) target bundleno = 511 (0x1ff), region = 32  ;;  %s438_s6 = sshll.u32 (!%p941_p7), %s860_s10, 3 }
  0x6a   : > { %s203_s1 = scalar_lea.sflag (!%p941_p7), [#allocation3], %s860_s10  ;;  %s206_s17 = scalar_lea.vmem (!%p941_p7), [#allocation2], %s438_s6 }
  0x70   : > { %642 = dma.done.wait (%p942_p1), %s203_s1, 128  }
  0x71   : > { %644 = vsyncadd (%p942_p1), %s203_s1, 4294967168  ;;  %s211_s28 = sand.u32 1, %s714_s16   ;;  %s215_s20 = scalar_lea.vmem [#allocation5], %s438_s6 }
  0x72   : > { %s212_s8 = scalar_lea.sflag [#allocation6], %s211_s28 }
  0x73   : > { %646 = dma.done.wait (%p942_p1), %s212_s8, 256  }
  0x74   : > { %648 = vsyncadd (%p942_p1), %s212_s8, 4294967040  ;;  %v256_v0 = vld [vmem:[%s206_s17] sm:$0xff]  ;;  %v257_v1 = vld [vmem:[%s215_s20] sm:$0xff]  ;;  %s224_s11 = scalar_lea.vmem [#allocation7], %s438_s6  ;;  %v286_v12 = vlaneseq  ;;  %s441_s22 = sshll.u32 %s714_s16, 3  ;;  %vm293_vm5 = vcmask 7168  }
  0x75   : > { %v258_v2 = vld [vmem:[%s224_s11] sm:$0xff]  ;;  %v259_v3 = vsub.f32 %v256_v0, %v257_v1  ;;  %v289_v18 = vstv %s441_s22  ;;  %s255_s9 = scalar_lea.vmem [#allocation8], %s860_s10  ;;  %s442_s30 = sshll.u32 %s714_s16, 4 }
  0x76   : > { %v261_v4 = vsub.f32 %v256_v0, %v258_v2  ;;  %v287_v15 = vshrl.u32 %v286_v12, 7  ;;  %s319_s25 = sshll.u32 %s255_s9, 4  ;;  %s881_s26 = scalar_lea.hbm %s925_s3, %s442_s30  ;;  %s876_s25 = int_to_ptr.vmem [resolvable:$true] %s319_s25 }
  0x77   : > { %v260_v5 = vadd.f32 1e-06, %v259_v3  ;;  %s307_s27 = scalar_lea.sflag [#allocation4], %s860_s10  ;;  %s597_s4 = scalar_lea.vmem %s876_s25, 16 }
  0x78   : > { %v262_v6 = vadd.f32 1e-06, %v261_v4  ;;  %v290_v24 = vadd.s32 %v289_v18, %v287_v15  ;;  %p598_p9 = scmp.ne.s32.totalorder %s876_s25, %s597_s4  ;;  %p943_p4 = scmp.ne.s32.totalorder %s932_s23, 0 }
  0x79   : > { %v263_v7 = vmul.f32 %v260_v5, %v260_v5  ;;  %s672_s16 = smov [#allocation8]  }
  0x7a   : > { %v273_v8 = vmul.f32 %v262_v6, %v262_v6  ;;  %vm291_vm4 = vcmp.lt.s32.totalorder %v290_v24, 20  ;;  %p599_p5 = pnand %p598_p9, %p943_p4  ;;  %s601_s7 = sshll.u32 %s672_s16, 4  ;;  %s602_s7 = int_to_ptr.vmem [resolvable:$false] %s601_s7 }
  0x7b   : > { %264 = vadd.xlane.f32.xlu0 %v263_v7  ;;  %s603_s6 = scalar_lea.vmem %s602_s7, 32  ;;  %p604_p6 = scmp.lt.s32.totalorder %s876_s25, %s602_s7 }
  0x7c   : > { %p600_p13 = pneg %p599_p5  ;;  %p605_p11 = scmp.lt.s32.totalorder %s603_s6, %s597_s4 }
  0x7e   : > { %p606_p3 = por %p605_p11, %p604_p6 }
  0x7f   : > { %274 = vadd.xlane.f32.xlu0 %v273_v8 }
  0x80   : > { %p607_p8 = pnand %p606_p3, %p600_p13 }
 0x108   : > { %v265_v9 = vpop.xlane.xlu0 %264 }
 0x109   : > { %503 = vrsqrt.f32 %v265_v9  ;;  %vm268_vm0 = vcmp.eq.f32.partialorder %v265_v9, inf  ;;  %v271_v20 = vand.u32 2147483648, %v265_v9  ;;  %vm270_vm2 = vcmp.eq.f32.partialorder %v265_v9, 0.0 }
 0x10c   : > { %v275_v10 = vpop.xlane.xlu0 %274 }
 0x10d   : > { %505 = vrsqrt.f32 %v275_v10  ;;  %vm278_vm1 = vcmp.eq.f32.partialorder %v275_v10, inf  ;;  %v281_v19 = vand.u32 2147483648, %v275_v10  ;;  %vm280_vm3 = vcmp.eq.f32.partialorder %v275_v10, 0.0 }
 0x113   : > { %v504_v11 = vpop.eup %503 }
 0x114   : > { %v267_v13 = vmul.f32 %v504_v11, %v265_v9 }
 0x116   : > { %v269_v17 = vsel %vm268_vm0, %v265_v9, %v267_v13 }
 0x117   : > { %v506_v14 = vpop.eup %505  ;;  %v272_v22 = vsel %vm270_vm2, %v271_v20, %v269_v17 }
 0x118   : > { %v277_v16 = vmul.f32 %v506_v14, %v275_v10 }
 0x11a   : > { %v279_v21 = vsel %vm278_vm1, %v275_v10, %v277_v16 }
 0x11b   : > { %v282_v23 = vsel %vm280_vm3, %v281_v19, %v279_v21 }
 0x11c   : > { %v283_v25 = vsub.f32 %v272_v22, %v282_v23 }
 0x11e   : > { %v284_v26 = vadd.f32 1.0, %v283_v25 }
 0x120   : > { %v285_v27 = vmax.f32 %v284_v26, 0.0 }
 0x122   : > { %v292_v28 = vsel %vm291_vm4, %v285_v27, 0.0 }
 0x123   : > { %v294_v29 = vsel %vm293_vm5, %v292_v28, 0.0 }
 0x124   : > { %295 = vadd.xlane.f32.xlu1 %v294_v29 }
 0x1b1   : > { %v296_v30 = vpop.xlane.xlu1 %295 }
 0x1b2   : > { %v297_v31 = vrot.slane %v296_v30, 4 }
 0x1b4   : > { %v298_v32 = vadd.f32 %v297_v31, %v296_v30 }
 0x1b6   : > { %v299_v33 = vrot.slane %v298_v32, 2 }
 0x1b8   : > { %v300_v34 = vadd.f32 %v299_v33, %v298_v32 }
 0x1ba   : > { %v301_v35 = vrot.slane %v300_v34, 1 }
 0x1bc   : > { %v302_v36 = vadd.f32 %v301_v35, %v300_v34 }
 0x1be   : > { %445 = vpush %v302_v36 }
 0x1ef   : > { %s446_s19 = spop %445 }
 0x1f0   : > { %v304_v37 = vstv %s446_s19 }
 0x1f1   : > { %305 = vst [vmem:[%s255_s9] sm:$0x1] %v304_v37 }
 0x1f2   : > { %610 = shalt.err (!%p607_p8)
}
 0x1f3   : > { %s611_s10 = scalar_lea.hbm %s881_s26, 16  ;;  %s615_s28 = scalar_lea.hbm %s925_s3, 48 }
 0x1f4   : > { %p612_p12 = scmp.ne.s32.totalorder %s881_s26, %s611_s10  ;;  %p616_p2 = scmp.lt.u32.totalorder %s881_s26, %s925_s3 }
 0x1f5   : > { %p617_p7 = scmp.lt.u32.totalorder %s615_s28, %s611_s10  ;;  %p619_p9 = scmp.lt.u32.totalorder %s611_s10, %s881_s26 }
 0x1f6   : > { %p613_p10 = pnand %p612_p12, %p943_p4 }
 0x1f7   : > { %p618_p1 = por %p617_p7, %p616_p2 }
 0x1f8   : > { %p614_p0 = pneg %p613_p10 }
 0x1f9   : > { %p620_p5 = por %p619_p9, %p618_p1 }
 0x1fb   : > { %p621_p13 = pnand %p620_p5, %p614_p0 }
 0x1fd   : > { %624 = shalt.err (!%p621_p13)
}
 0x1fe   : > { %453 = dma.vmem_to_hbm [thread:$0]  (%p943_p4), %s876_s25, 16, %s881_s26, %s307_s27  }
 0x1ff PF: > { %p470_p6 = scmp.ge.s32.totalorder %s667_s15, 2  ;;  %s331_s11 = sand.u32 1, %s655_s12  }
 0x200   : > { %p944_p11 = scmp.ne.s32.totalorder %s933_s24, 0  ;;  %s332_s22 = scalar_lea.sflag [#allocation4], %s331_s11 }
 0x202   : > { %p466_p3 = pnand %p470_p6, %p944_p11 }
 0x204   : > { %650 = dma.done.wait (!%p466_p3), %s332_s22, 16  }
 0x205   : > { %652 = vsyncadd (!%p466_p3), %s332_s22, 4294967280  ;;  %p19_p8 = scmp.ge.s32.totalorder %s718_s18, 5   ;;  %s945_s12 = smov %s659_s13 }
 0x206   : > { %s946_s13 = smov %s663_s14  ;;  %s947_s14 = smov %s730_s21 }
 0x207   : > { %s948_s15 = smov %s718_s18  ;;  %21 = sbr.rel (!%p19_p8) target bundleno = 9 (0x9), region = 101 }
 0x20e   :  { %336 = vsyncpa [#allocation3], 1 }
 0x20f   :  { %338 = vsyncpa [#allocation3 + $0x1], 1 }
 0x210   :  { %339 = vsyncpa [#allocation6], 1 }
 0x211   :  { %341 = vsyncpa [#allocation6 + $0x1], 1 }
 0x212   :  { %342 = vsyncpa [#allocation4], 1 }
 0x213   :  { %344 = vsyncpa [#allocation4 + $0x1], 1 }

</bundles_post_ra>
